<compile_context>
chip_gen: v5e
topology: v5e:2x2
jax: 0.10.0
libtpu: 0.0.40
codegen_flags: <defaults>
</compile_context>

<pallas_src>
import math

import jax
import jax.numpy as jnp
from jax.experimental import pallas as pl
from jax.experimental.pallas import tpu as pltpu


# ------------------------------ Pallas kernel ------------------------------ #
def gat_fused_kernel(x_ref, xt_ref, w_ref, wsrc_ref, wdst_ref, ae_ref,
                     cb_ref, pool_ref, w1_ref, b1_ref, w2_ref, b2_ref,
                     logp_ref, out_ref, last_ref, acc_ref):
    """One attention head per grid step; fc1/fc2/log_softmax on the last step."""
    h = pl.program_id(0)

    @pl.when(h == 0)
    def _():
        acc_ref[...] = jnp.zeros_like(acc_ref)

    x = x_ref[...]                                                    # [N, F]
    # Node linear for this head (tiny, kept f32 for the attention path).
    xs = jnp.dot(x, w_ref[...], preferred_element_type=jnp.float32)  # [N, C]
    # Attention coefficients as small MXU matmuls (att vectors folded into W).
    a_dst = jnp.dot(x, wdst_ref[...],
                    preferred_element_type=jnp.float32)               # [N, 1]
    a_src = jnp.dot(wsrc_ref[...], xt_ref[...],
                    preferred_element_type=jnp.float32)               # [1, N]

    # Edge-score slab already carries the -1e30 mask on non-edges.
    logits = a_dst + a_src + ae_ref[...]                              # [N(dst), N(src)]
    logits = jnp.where(logits >= 0, logits, 0.2 * logits)             # leaky_relu(0.2)

    # Row-wise softmax over incoming edges (f32); masked entries -> exactly 0.
    m = jnp.max(logits, axis=1, keepdims=True)
    e = jnp.exp(logits - m)
    inv = pl.reciprocal(jnp.sum(e, axis=1, keepdims=True), approx=True)
    attn = e * inv

    # Attention-weighted aggregation: bf16 operands on the MXU, f32 accumulate.
    out_h = jnp.dot(attn.astype(jnp.bfloat16), xs.astype(jnp.bfloat16),
                    preferred_element_type=jnp.float32)               # [N, C]
    node_h = out_h + cb_ref[...]                                      # + per-head conv bias

    # global_add_pool for this head's channels.
    pooled_h = jnp.dot(pool_ref[...], node_h,
                       preferred_element_type=jnp.float32)            # [B, C]

    # fc1 over the concatenated heads == sum over heads of [B,C] @ [C,DE];
    # accumulated across grid steps — no [H,B,C] HBM round trip needed.
    acc_ref[...] += jnp.dot(pooled_h, w1_ref[...],
                            preferred_element_type=jnp.float32)       # [B, DE]

    @pl.when(h == pl.num_programs(0) - 1)
    def _():
        h1 = jnp.maximum(acc_ref[...] + b1_ref[...], 0.0)             # relu(fc1)
        # TODO(synk): nn.Dropout(p=0.2) is treated as identity (inference);
        # torch RNG-driven stochastic dropout has no deterministic Pallas
        # equivalent here.
        o = jnp.dot(h1, w2_ref[...],
                    preferred_element_type=jnp.float32) + b2_ref[...] # [B, T]
        mx = jnp.max(o, axis=1, keepdims=True)
        lse = jnp.log(jnp.sum(jnp.exp(o - mx), axis=1, keepdims=True)) + mx
        logp_ref[...] = o - lse                                       # log_softmax(dim=1)
        out_ref[...] = o
        last_ref[...] = h1


# ------------------------------ glue helpers ------------------------------ #
def build_dense_graph(params, edge_index, edge_attr, batch, num_nodes,
                      num_graphs, heads, out_ch):
    """Densify the graph: adjacency, per-head edge scores, pooling matrix."""
    src, dst = edge_index[0], edge_index[1]
    We = params["lin_edge_w"]                                  # [5, H*C]
    att_edge = params["att_edge"]                              # [H, C]

    ef = (edge_attr @ We).reshape(-1, heads, out_ch)           # [E, H, C]
    ae_edges = jnp.sum(ef * att_edge[None], axis=-1)           # [E, H]

    # self-loop edge_attr = per-target-node mean of incoming attrs (fill_value='mean')
    sum_attr = jnp.zeros((num_nodes, edge_attr.shape[1]), jnp.float32).at[dst].add(edge_attr)
    cnt = jnp.zeros((num_nodes,), jnp.float32).at[dst].add(1.0)
    loop_attr = sum_attr / jnp.maximum(cnt, 1.0)[:, None]
    efl = (loop_attr @ We).reshape(num_nodes, heads, out_ch)
    ae_loop = jnp.sum(efl * att_edge[None], axis=-1)           # [N, H]

    ae_dense = jnp.zeros((heads, num_nodes, num_nodes), jnp.float32)
    ae_dense = ae_dense.at[:, dst, src].set(ae_edges.T)
    idx = jnp.arange(num_nodes)
    ae_dense = ae_dense.at[:, idx, idx].set(ae_loop.T)

    adj = jnp.zeros((num_nodes, num_nodes), jnp.float32).at[dst, src].set(1.0)
    adj = adj.at[idx, idx].set(1.0)

    pool_mat = (batch[None, :] == jnp.arange(num_graphs)[:, None]).astype(jnp.float32)
    return ae_dense, adj, pool_mat


def graph_gat_forward(params, x, edge_index, edge_attr, batch, num_graphs,
                      nheads, dim_embedding):
    N, F = x.shape
    H = nheads
    C = dim_embedding // 2
    DE = params["fc1_w"].shape[1]
    T = params["fc2_w"].shape[1]
    B = num_graphs

    ae_dense, adj, pool_mat = build_dense_graph(
        params, edge_index, edge_attr, batch, N, B, H, C)

    # Fold the adjacency mask into the edge-score slab once (wrapper side):
    # masked logits underflow to exactly 0 after exp, so the kernel needs no
    # per-head compare/select and no `* adj` after the exp.
    ae_masked = jnp.where(adj[None] > 0, ae_dense, jnp.float32(-1e30))   # [H, N, N]

    # Per-head slabs + att vectors folded into the node linear.
    w_heads = params["lin_w"].reshape(F, H, C).transpose(1, 0, 2)          # [H, F, C]
    w_src = jnp.einsum("hfc,hc->hf", w_heads, params["att_src"])[:, None, :]   # [H, 1, F]
    w_dst = jnp.einsum("hfc,hc->hf", w_heads, params["att_dst"])[:, :, None]   # [H, F, 1]
    cb_heads = params["conv_bias"].reshape(1, H, C).transpose(1, 0, 2)     # [H, 1, C]
    w1_heads = params["fc1_w"].reshape(H, C, DE)                           # [H, C, DE]
    xT = x.T                                                               # [F, N]

    logp, out, last = pl.pallas_call(
        gat_fused_kernel,
        grid=(H,),
        out_shape=(
            jax.ShapeDtypeStruct((B, T), jnp.float32),         # log_softmax
            jax.ShapeDtypeStruct((B, T), jnp.float32),         # logits (out)
            jax.ShapeDtypeStruct((B, DE), jnp.float32),        # last_layer
        ),
        in_specs=[
            pl.BlockSpec((N, F), lambda h: (0, 0)),            # x
            pl.BlockSpec((F, N), lambda h: (0, 0)),            # x^T
            pl.BlockSpec((None, F, C), lambda h: (h, 0, 0)),   # W_h
            pl.BlockSpec((None, 1, F), lambda h: (h, 0, 0)),   # W_h @ att_src_h
            pl.BlockSpec((None, F, 1), lambda h: (h, 0, 0)),   # W_h @ att_dst_h
            pl.BlockSpec((None, N, N), lambda h: (h, 0, 0)),   # masked edge scores
            pl.BlockSpec((None, 1, C), lambda h: (h, 0, 0)),   # per-head conv bias
            pl.BlockSpec((B, N), lambda h: (0, 0)),            # pooling matrix
            pl.BlockSpec((None, C, DE), lambda h: (h, 0, 0)),  # fc1 weights (per head)
            pl.BlockSpec((1, DE), lambda h: (0, 0)),           # fc1 bias
            pl.BlockSpec((DE, T), lambda h: (0, 0)),           # fc2 weights
            pl.BlockSpec((1, T), lambda h: (0, 0)),            # fc2 bias
        ],
        out_specs=(
            pl.BlockSpec((B, T), lambda h: (0, 0)),
            pl.BlockSpec((B, T), lambda h: (0, 0)),
            pl.BlockSpec((B, DE), lambda h: (0, 0)),
        ),
        scratch_shapes=[pltpu.VMEM((B, DE), jnp.float32)],     # fc1 accumulator
        compiler_params=pltpu.CompilerParams(
            dimension_semantics=("arbitrary",)),               # head axis is a reduction
    )(x, xT, w_heads, w_src, w_dst, ae_masked, cb_heads, pool_mat,
      w1_heads, params["fc1_b"], params["fc2_w"], params["fc2_b"])
    # TODO(synk): for large N this extends to grid=(H, cdiv(N, TQ)) with a
    # (TQ, N) dst-row tile of ae_masked and accumulation into the fc1 scratch.
    return logp, out, last


def reference_forward(params, x, edge_index, edge_attr, batch, num_graphs,
                      nheads, dim_embedding):
    """Pure-JAX f32 dense reference of the same forward pass."""
    N = x.shape[0]
    H = nheads
    C = dim_embedding // 2
    ae_dense, adj, pool_mat = build_dense_graph(
        params, edge_index, edge_attr, batch, N, num_graphs, H, C)

    xs = (x @ params["lin_w"]).reshape(N, H, C)
    a_s = jnp.sum(xs * params["att_src"][None], axis=-1)       # [N, H]
    a_d = jnp.sum(xs * params["att_dst"][None], axis=-1)       # [N, H]
    logits = a_d[:, None, :] + a_s[None, :, :] + jnp.transpose(ae_dense, (1, 2, 0))
    logits = jnp.where(logits >= 0, logits, 0.2 * logits)
    masked = jnp.where(adj[:, :, None] > 0, logits, -1e30)
    attn = jax.nn.softmax(masked, axis=1) * adj[:, :, None]
    out3 = jnp.einsum('ijh,jhc->ihc', attn, xs)
    node_out = out3.reshape(N, H * C) + params["conv_bias"][0]
    pooled = pool_mat @ node_out
    h1 = jnp.maximum(pooled @ params["fc1_w"] + params["fc1_b"][0], 0.0)
    o = h1 @ params["fc2_w"] + params["fc2_b"][0]
    return jax.nn.log_softmax(o, axis=1), o, h1


def init_params(key, nheads, dim_features, dim_embedding, dim_target):
    H = nheads
    C = dim_embedding // 2
    HC = H * C
    ks = jax.random.split(key, 10)

    def nrm(k, shape, scale):
        return (scale * jax.random.normal(k, shape)).astype(jnp.float32)

    return {
        "lin_w":      nrm(ks[0], (dim_features, HC), 1.0 / math.sqrt(dim_features)),
        "lin_edge_w": nrm(ks[1], (5, HC),            1.0 / math.sqrt(5.0)),
        "att_src":    nrm(ks[2], (H, C),             1.0 / math.sqrt(C)),
        "att_dst":    nrm(ks[3], (H, C),             1.0 / math.sqrt(C)),
        "att_edge":   nrm(ks[4], (H, C),             1.0 / math.sqrt(C)),
        "conv_bias":  nrm(ks[5], (1, HC),            0.1),
        "fc1_w":      nrm(ks[6], (HC, dim_embedding), 1.0 / math.sqrt(HC)),
        "fc1_b":      nrm(ks[7], (1, dim_embedding), 0.1),
        "fc2_w":      nrm(ks[8], (dim_embedding, dim_target), 1.0 / math.sqrt(dim_embedding)),
        "fc2_b":      nrm(ks[9], (1, dim_target),    0.1),
    }


if __name__ == "__main__":
    nheads, dim_features, dim_embedding, dim_target = 4, 8, 32, 6
    nodes_per_graph, num_graphs = 8, 2
    N = nodes_per_graph * num_graphs

    key = jax.random.PRNGKey(0)
    kx, ke, kp = jax.random.split(key, 3)

    x = jax.random.normal(kx, (N, dim_features), jnp.float32)

    # directed ring within each graph (both directions) -> unique edges, no self loops
    srcs, dsts = [], []
    for g in range(num_graphs):
        off = g * nodes_per_graph
        for i in range(nodes_per_graph):
            j = (i + 1) % nodes_per_graph
            srcs += [off + i, off + j]
            dsts += [off + j, off + i]
    edge_index = jnp.array([srcs, dsts], dtype=jnp.int32)         # [2, E]
    edge_attr = jax.random.normal(ke, (edge_index.shape[1], 5), jnp.float32)
    batch = jnp.repeat(jnp.arange(num_graphs, dtype=jnp.int32), nodes_per_graph)

    params = init_params(kp, nheads, dim_features, dim_embedding, dim_target)

    logp, out, last = graph_gat_forward(
        params, x, edge_index, edge_attr, batch, num_graphs, nheads, dim_embedding)
    jax.block_until_ready((logp, out, last))

    r_logp, r_out, r_last = reference_forward(
        params, x, edge_index, edge_attr, batch, num_graphs, nheads, dim_embedding)

    # The kernel uses bf16 MXU operands on the aggregation and an approximate
    # EUP reciprocal for the softmax denominator; vs the pure-f32 reference
    # this costs ~1e-2 relative error (structural bugs would be O(1)).
    for got, want in ((logp, r_logp), (out, r_out), (last, r_last)):
        assert got.shape == want.shape, (got.shape, want.shape)
        assert jnp.allclose(got, want, atol=1e-1, rtol=1e-1), \
            float(jnp.max(jnp.abs(got - want)))

    print("KERNEL_OK")
</pallas_src>

<mosaic_0001>
module attributes {stable_mosaic.version = 11 : i64} {
  func.func @gat_fused_kernel(%arg0: i32, %arg1: memref<16x8xf32, #tpu.memory_space<vmem>>, %arg2: memref<8x16xf32, #tpu.memory_space<vmem>>, %arg3: memref<1x8x16xf32, #tpu.memory_space<vmem>>, %arg4: memref<1x1x8xf32, #tpu.memory_space<vmem>>, %arg5: memref<1x8x1xf32, #tpu.memory_space<vmem>>, %arg6: memref<1x16x16xf32, #tpu.memory_space<vmem>>, %arg7: memref<1x1x16xf32, #tpu.memory_space<vmem>>, %arg8: memref<2x16xf32, #tpu.memory_space<vmem>>, %arg9: memref<1x16x32xf32, #tpu.memory_space<vmem>>, %arg10: memref<1x32xf32, #tpu.memory_space<vmem>>, %arg11: memref<32x6xf32, #tpu.memory_space<vmem>>, %arg12: memref<1x6xf32, #tpu.memory_space<vmem>>, %arg13: memref<2x6xf32, #tpu.memory_space<vmem>>, %arg14: memref<2x6xf32, #tpu.memory_space<vmem>>, %arg15: memref<2x32xf32, #tpu.memory_space<vmem>>, %arg16: memref<2x32xf32, #tpu.memory_space<vmem>>) attributes {dimension_semantics = [#tpu.dimension_semantics<arbitrary>], iteration_bounds = array<i64: 4>, scalar_prefetch = 0 : i64, scratch_operands = 1 : i64, tpu.core_type = #tpu.core_type<tc>, window_params = [{pipeline_mode = #tpu.pipeline_mode<synchronous>, transform_indices = @transform_0, window_bounds = array<i64: 16, 8>}, {pipeline_mode = #tpu.pipeline_mode<synchronous>, transform_indices = @transform_1, window_bounds = array<i64: 8, 16>}, {transform_indices = @transform_2, window_bounds = array<i64: 1, 8, 16>}, {transform_indices = @transform_3, window_bounds = array<i64: 1, 1, 8>}, {transform_indices = @transform_4, window_bounds = array<i64: 1, 8, 1>}, {transform_indices = @transform_5, window_bounds = array<i64: 1, 16, 16>}, {transform_indices = @transform_6, window_bounds = array<i64: 1, 1, 16>}, {pipeline_mode = #tpu.pipeline_mode<synchronous>, transform_indices = @transform_7, window_bounds = array<i64: 2, 16>}, {transform_indices = @transform_8, window_bounds = array<i64: 1, 16, 32>}, {pipeline_mode = #tpu.pipeline_mode<synchronous>, transform_indices = @transform_9, window_bounds = array<i64: 1, 32>}, {pipeline_mode = #tpu.pipeline_mode<synchronous>, transform_indices = @transform_10, window_bounds = array<i64: 32, 6>}, {pipeline_mode = #tpu.pipeline_mode<synchronous>, transform_indices = @transform_11, window_bounds = array<i64: 1, 6>}, {pipeline_mode = #tpu.pipeline_mode<synchronous>, transform_indices = @transform_12, window_bounds = array<i64: 2, 6>}, {pipeline_mode = #tpu.pipeline_mode<synchronous>, transform_indices = @transform_13, window_bounds = array<i64: 2, 6>}, {pipeline_mode = #tpu.pipeline_mode<synchronous>, transform_indices = @transform_14, window_bounds = array<i64: 2, 32>}]} {
    %c0_i32 = arith.constant 0 : i32
    %0 = arith.cmpi eq, %arg0, %c0_i32 : i32
    %1 = arith.extui %0 : i1 to i32
    %c0_i32_0 = arith.constant 0 : i32
    %2 = arith.cmpi ne, %1, %c0_i32_0 : i32
    scf.if %2 {
      %cst_38 = arith.constant 0.000000e+00 : f32
      %53 = vector.broadcast %cst_38 : f32 to vector<2x32xf32>
      %c0_39 = arith.constant 0 : index
      %c0_40 = arith.constant 0 : index
      %54 = vector.load %arg16[%c0_39, %c0_40] : memref<2x32xf32, #tpu.memory_space<vmem>>, vector<2x32xf32>
      tpu.vector_store %arg16[%c0_39, %c0_40], %53 {strides = array<i32>} : memref<2x32xf32, #tpu.memory_space<vmem>>, vector<2x32xf32>,
    } else {
    }
    %c0 = arith.constant 0 : index
    %c0_1 = arith.constant 0 : index
    %3 = vector.load %arg1[%c0, %c0_1] : memref<16x8xf32, #tpu.memory_space<vmem>>, vector<16x8xf32>
    %c0_2 = arith.constant 0 : index
    %c0_3 = arith.constant 0 : index
    %c0_4 = arith.constant 0 : index
    %4 = vector.load %arg3[%c0_2, %c0_3, %c0_4] : memref<1x8x16xf32, #tpu.memory_space<vmem>>, vector<1x8x16xf32>
    %5 = vector.shape_cast %4 : vector<1x8x16xf32> to vector<8x16xf32>
    %cst = arith.constant dense<0.000000e+00> : vector<16x16xf32>
    %6 = tpu.matmul %3, %5, %cst {dimension_numbers = #tpu.dot_dimension_numbers<[1], [0], [0], [1], [0, 0, 1, 1], [], []>} : vector<16x8xf32>, vector<8x16xf32>, vector<16x16xf32> -> vector<16x16xf32>
    %c0_5 = arith.constant 0 : index
    %c0_6 = arith.constant 0 : index
    %c0_7 = arith.constant 0 : index
    %7 = vector.load %arg5[%c0_5, %c0_6, %c0_7] : memref<1x8x1xf32, #tpu.memory_space<vmem>>, vector<1x8x1xf32>
    %8 = vector.shape_cast %7 : vector<1x8x1xf32> to vector<8x1xf32>
    %cst_8 = arith.constant dense<0.000000e+00> : vector<16x1xf32>
    %9 = tpu.matmul %3, %8, %cst_8 {dimension_numbers = #tpu.dot_dimension_numbers<[1], [0], [0], [1], [0, 0, 1, 1], [], []>} : vector<16x8xf32>, vector<8x1xf32>, vector<16x1xf32> -> vector<16x1xf32>
    %c0_9 = arith.constant 0 : index
    %c0_10 = arith.constant 0 : index
    %c0_11 = arith.constant 0 : index
    %10 = vector.load %arg4[%c0_9, %c0_10, %c0_11] : memref<1x1x8xf32, #tpu.memory_space<vmem>>, vector<1x1x8xf32>
    %11 = vector.shape_cast %10 : vector<1x1x8xf32> to vector<1x8xf32>
    %c0_12 = arith.constant 0 : index
    %c0_13 = arith.constant 0 : index
    %12 = vector.load %arg2[%c0_12, %c0_13] : memref<8x16xf32, #tpu.memory_space<vmem>>, vector<8x16xf32>
    %cst_14 = arith.constant dense<0.000000e+00> : vector<1x16xf32>
    %13 = tpu.matmul %11, %12, %cst_14 {dimension_numbers = #tpu.dot_dimension_numbers<[1], [0], [0], [1], [0, 0, 1, 1], [], []>} : vector<1x8xf32>, vector<8x16xf32>, vector<1x16xf32> -> vector<1x16xf32>
    %14 = vector.broadcast %9 : vector<16x1xf32> to vector<16x16xf32>
    %15 = vector.broadcast %13 : vector<1x16xf32> to vector<16x16xf32>
    %16 = arith.addf %14, %15 : vector<16x16xf32>
    %c0_15 = arith.constant 0 : index
    %c0_16 = arith.constant 0 : index
    %c0_17 = arith.constant 0 : index
    %17 = vector.load %arg6[%c0_15, %c0_16, %c0_17] : memref<1x16x16xf32, #tpu.memory_space<vmem>>, vector<1x16x16xf32>
    %18 = vector.shape_cast %17 : vector<1x16x16xf32> to vector<16x16xf32>
    %19 = arith.addf %16, %18 : vector<16x16xf32>
    %cst_18 = arith.constant 0.000000e+00 : f32
    %20 = vector.broadcast %cst_18 : f32 to vector<16x16xf32>
    %21 = arith.cmpf oge, %19, %20 : vector<16x16xf32>
    %cst_19 = arith.constant 2.000000e-01 : f32
    %22 = vector.broadcast %cst_19 : f32 to vector<16x16xf32>
    %23 = arith.mulf %22, %19 : vector<16x16xf32>
    %24 = arith.select %21, %19, %23 : vector<16x16xi1>, vector<16x16xf32>
    %cst_20 = arith.constant dense<0xFF800000> : vector<16xf32>
    %25 = vector.multi_reduction <maximumf>, %24, %cst_20 [1] : vector<16x16xf32> to vector<16xf32>
    %26 = vector.shape_cast %25 : vector<16xf32> to vector<16x1xf32>
    %27 = vector.broadcast %26 : vector<16x1xf32> to vector<16x16xf32>
    %28 = arith.subf %24, %27 : vector<16x16xf32>
    %29 = math.exp %28 : vector<16x16xf32>
    %cst_21 = arith.constant dense<0.000000e+00> : vector<16xf32>
    %30 = vector.multi_reduction <add>, %29, %cst_21 [1] : vector<16x16xf32> to vector<16xf32>
    %31 = vector.shape_cast %30 : vector<16xf32> to vector<16x1xf32>
    %32 = tpu.reciprocal %31 {approx = true} : vector<16x1xf32> -> vector<16x1xf32>
    %33 = vector.broadcast %32 : vector<16x1xf32> to vector<16x16xf32>
    %34 = arith.mulf %29, %33 : vector<16x16xf32>
    %35 = arith.truncf %34 : vector<16x16xf32> to vector<16x16xbf16>
    %36 = arith.truncf %6 : vector<16x16xf32> to vector<16x16xbf16>
    %cst_22 = arith.constant dense<0.000000e+00> : vector<16x16xf32>
    %37 = tpu.matmul %35, %36, %cst_22 {dimension_numbers = #tpu.dot_dimension_numbers<[1], [0], [0], [1], [0, 0, 1, 1], [], []>} : vector<16x16xbf16>, vector<16x16xbf16>, vector<16x16xf32> -> vector<16x16xf32>
    %c0_23 = arith.constant 0 : index
    %c0_24 = arith.constant 0 : index
    %c0_25 = arith.constant 0 : index
    %38 = vector.load %arg7[%c0_23, %c0_24, %c0_25] : memref<1x1x16xf32, #tpu.memory_space<vmem>>, vector<1x1x16xf32>
    %39 = vector.shape_cast %38 : vector<1x1x16xf32> to vector<1x16xf32>
    %40 = vector.broadcast %39 : vector<1x16xf32> to vector<16x16xf32>
    %41 = arith.addf %37, %40 : vector<16x16xf32>
    %c0_26 = arith.constant 0 : index
    %c0_27 = arith.constant 0 : index
    %42 = vector.load %arg8[%c0_26, %c0_27] : memref<2x16xf32, #tpu.memory_space<vmem>>, vector<2x16xf32>
    %cst_28 = arith.constant dense<0.000000e+00> : vector<2x16xf32>
    %43 = tpu.matmul %42, %41, %cst_28 {dimension_numbers = #tpu.dot_dimension_numbers<[1], [0], [0], [1], [0, 0, 1, 1], [], []>} : vector<2x16xf32>, vector<16x16xf32>, vector<2x16xf32> -> vector<2x16xf32>
    %c0_29 = arith.constant 0 : index
    %c0_30 = arith.constant 0 : index
    %44 = vector.load %arg16[%c0_29, %c0_30] : memref<2x32xf32, #tpu.memory_space<vmem>>, vector<2x32xf32>
    %c0_31 = arith.constant 0 : index
    %c0_32 = arith.constant 0 : index
    %c0_33 = arith.constant 0 : index
    %45 = vector.load %arg9[%c0_31, %c0_32, %c0_33] : memref<1x16x32xf32, #tpu.memory_space<vmem>>, vector<1x16x32xf32>
    %46 = vector.shape_cast %45 : vector<1x16x32xf32> to vector<16x32xf32>
    %cst_34 = arith.constant dense<0.000000e+00> : vector<2x32xf32>
    %47 = tpu.matmul %43, %46, %cst_34 {dimension_numbers = #tpu.dot_dimension_numbers<[1], [0], [0], [1], [0, 0, 1, 1], [], []>} : vector<2x16xf32>, vector<16x32xf32>, vector<2x32xf32> -> vector<2x32xf32>
    %48 = arith.addf %44, %47 : vector<2x32xf32>
    %c0_35 = arith.constant 0 : index
    %c0_36 = arith.constant 0 : index
    %49 = vector.load %arg16[%c0_35, %c0_36] : memref<2x32xf32, #tpu.memory_space<vmem>>, vector<2x32xf32>
    tpu.vector_store %arg16[%c0_35, %c0_36], %48 {strides = array<i32>} : memref<2x32xf32, #tpu.memory_space<vmem>>, vector<2x32xf32>,
    %c3_i32 = arith.constant 3 : i32
    %50 = arith.cmpi eq, %arg0, %c3_i32 : i32
    %51 = arith.extui %50 : i1 to i32
    %c0_i32_37 = arith.constant 0 : i32
    %52 = arith.cmpi ne, %51, %c0_i32_37 : i32
    scf.if %52 {
      %c0_38 = arith.constant 0 : index
      %c0_39 = arith.constant 0 : index
      %53 = vector.load %arg16[%c0_38, %c0_39] : memref<2x32xf32, #tpu.memory_space<vmem>>, vector<2x32xf32>
      %c0_40 = arith.constant 0 : index
      %c0_41 = arith.constant 0 : index
      %54 = vector.load %arg10[%c0_40, %c0_41] : memref<1x32xf32, #tpu.memory_space<vmem>>, vector<1x32xf32>
      %55 = vector.broadcast %54 : vector<1x32xf32> to vector<2x32xf32>
      %56 = arith.addf %53, %55 : vector<2x32xf32>
      %cst_42 = arith.constant 0.000000e+00 : f32
      %57 = vector.broadcast %cst_42 : f32 to vector<2x32xf32>
      %58 = arith.maximumf %56, %57 : vector<2x32xf32>
      %c0_43 = arith.constant 0 : index
      %c0_44 = arith.constant 0 : index
      %59 = vector.load %arg11[%c0_43, %c0_44] : memref<32x6xf32, #tpu.memory_space<vmem>>, vector<32x6xf32>
      %cst_45 = arith.constant dense<0.000000e+00> : vector<2x6xf32>
      %60 = tpu.matmul %58, %59, %cst_45 {dimension_numbers = #tpu.dot_dimension_numbers<[1], [0], [0], [1], [0, 0, 1, 1], [], []>} : vector<2x32xf32>, vector<32x6xf32>, vector<2x6xf32> -> vector<2x6xf32>
      %c0_46 = arith.constant 0 : index
      %c0_47 = arith.constant 0 : index
      %61 = vector.load %arg12[%c0_46, %c0_47] : memref<1x6xf32, #tpu.memory_space<vmem>>, vector<1x6xf32>
      %62 = vector.broadcast %61 : vector<1x6xf32> to vector<2x6xf32>
      %63 = arith.addf %60, %62 : vector<2x6xf32>
      %cst_48 = arith.constant dense<0xFF800000> : vector<2xf32>
      %64 = vector.multi_reduction <maximumf>, %63, %cst_48 [1] : vector<2x6xf32> to vector<2xf32>
      %65 = vector.shape_cast %64 : vector<2xf32> to vector<2x1xf32>
      %66 = vector.broadcast %65 : vector<2x1xf32> to vector<2x6xf32>
      %67 = arith.subf %63, %66 : vector<2x6xf32>
      %68 = math.exp %67 : vector<2x6xf32>
      %cst_49 = arith.constant dense<0.000000e+00> : vector<2xf32>
      %69 = vector.multi_reduction <add>, %68, %cst_49 [1] : vector<2x6xf32> to vector<2xf32>
      %70 = vector.shape_cast %69 : vector<2xf32> to vector<2x1xf32>
      %71 = math.log %70 : vector<2x1xf32>
      %72 = arith.addf %71, %65 : vector<2x1xf32>
      %73 = vector.broadcast %72 : vector<2x1xf32> to vector<2x6xf32>
      %74 = arith.subf %63, %73 : vector<2x6xf32>
      %c0_50 = arith.constant 0 : index
      %c0_51 = arith.constant 0 : index
      %75 = vector.load %arg13[%c0_50, %c0_51] : memref<2x6xf32, #tpu.memory_space<vmem>>, vector<2x6xf32>
      tpu.vector_store %arg13[%c0_50, %c0_51], %74 {strides = array<i32>} : memref<2x6xf32, #tpu.memory_space<vmem>>, vector<2x6xf32>,
      %c0_52 = arith.constant 0 : index
      %c0_53 = arith.constant 0 : index
      %76 = vector.load %arg14[%c0_52, %c0_53] : memref<2x6xf32, #tpu.memory_space<vmem>>, vector<2x6xf32>
      tpu.vector_store %arg14[%c0_52, %c0_53], %63 {strides = array<i32>} : memref<2x6xf32, #tpu.memory_space<vmem>>, vector<2x6xf32>,
      %c0_54 = arith.constant 0 : index
      %c0_55 = arith.constant 0 : index
      %77 = vector.load %arg15[%c0_54, %c0_55] : memref<2x32xf32, #tpu.memory_space<vmem>>, vector<2x32xf32>
      tpu.vector_store %arg15[%c0_54, %c0_55], %58 {strides = array<i32>} : memref<2x32xf32, #tpu.memory_space<vmem>>, vector<2x32xf32>,
    } else {
    }
    return
  }
  func.func @transform_0(%arg0: i32) -> (i32, i32) {
    %c0_i32 = arith.constant 0 : i32
    %c0_i32_0 = arith.constant 0 : i32
    %c0_i32_1 = arith.constant 0 : i32
    return %c0_i32, %c0_i32_0 : i32, i32
  }
  func.func @transform_1(%arg0: i32) -> (i32, i32) {
    %c0_i32 = arith.constant 0 : i32
    %c0_i32_0 = arith.constant 0 : i32
    %c0_i32_1 = arith.constant 0 : i32
    return %c0_i32, %c0_i32_0 : i32, i32
  }
  func.func @transform_2(%arg0: i32) -> (i32, i32, i32) {
    %c0_i32 = arith.constant 0 : i32
    %c0_i32_0 = arith.constant 0 : i32
    %c0_i32_1 = arith.constant 0 : i32
    return %arg0, %c0_i32, %c0_i32_0 : i32, i32, i32
  }
  func.func @transform_3(%arg0: i32) -> (i32, i32, i32) {
    %c0_i32 = arith.constant 0 : i32
    %c0_i32_0 = arith.constant 0 : i32
    %c0_i32_1 = arith.constant 0 : i32
    return %arg0, %c0_i32, %c0_i32_0 : i32, i32, i32
  }
  func.func @transform_4(%arg0: i32) -> (i32, i32, i32) {
    %c0_i32 = arith.constant 0 : i32
    %c0_i32_0 = arith.constant 0 : i32
    %c0_i32_1 = arith.constant 0 : i32
    return %arg0, %c0_i32, %c0_i32_0 : i32, i32, i32
  }
  func.func @transform_5(%arg0: i32) -> (i32, i32, i32) {
    %c0_i32 = arith.constant 0 : i32
    %c0_i32_0 = arith.constant 0 : i32
    %c0_i32_1 = arith.constant 0 : i32
    return %arg0, %c0_i32, %c0_i32_0 : i32, i32, i32
  }
  func.func @transform_6(%arg0: i32) -> (i32, i32, i32) {
    %c0_i32 = arith.constant 0 : i32
    %c0_i32_0 = arith.constant 0 : i32
    %c0_i32_1 = arith.constant 0 : i32
    return %arg0, %c0_i32, %c0_i32_0 : i32, i32, i32
  }
  func.func @transform_7(%arg0: i32) -> (i32, i32) {
    %c0_i32 = arith.constant 0 : i32
    %c0_i32_0 = arith.constant 0 : i32
    %c0_i32_1 = arith.constant 0 : i32
    return %c0_i32, %c0_i32_0 : i32, i32
  }
  func.func @transform_8(%arg0: i32) -> (i32, i32, i32) {
    %c0_i32 = arith.constant 0 : i32
    %c0_i32_0 = arith.constant 0 : i32
    %c0_i32_1 = arith.constant 0 : i32
    return %arg0, %c0_i32, %c0_i32_0 : i32, i32, i32
  }
  func.func @transform_9(%arg0: i32) -> (i32, i32) {
    %c0_i32 = arith.constant 0 : i32
    %c0_i32_0 = arith.constant 0 : i32
    %c0_i32_1 = arith.constant 0 : i32
    return %c0_i32, %c0_i32_0 : i32, i32
  }
  func.func @transform_10(%arg0: i32) -> (i32, i32) {
    %c0_i32 = arith.constant 0 : i32
    %c0_i32_0 = arith.constant 0 : i32
    %c0_i32_1 = arith.constant 0 : i32
    return %c0_i32, %c0_i32_0 : i32, i32
  }
  func.func @transform_11(%arg0: i32) -> (i32, i32) {
    %c0_i32 = arith.constant 0 : i32
    %c0_i32_0 = arith.constant 0 : i32
    %c0_i32_1 = arith.constant 0 : i32
    return %c0_i32, %c0_i32_0 : i32, i32
  }
  func.func @transform_12(%arg0: i32) -> (i32, i32) {
    %c0_i32 = arith.constant 0 : i32
    %c0_i32_0 = arith.constant 0 : i32
    %c0_i32_1 = arith.constant 0 : i32
    return %c0_i32, %c0_i32_0 : i32, i32
  }
  func.func @transform_13(%arg0: i32) -> (i32, i32) {
    %c0_i32 = arith.constant 0 : i32
    %c0_i32_0 = arith.constant 0 : i32
    %c0_i32_1 = arith.constant 0 : i32
    return %c0_i32, %c0_i32_0 : i32, i32
  }
  func.func @transform_14(%arg0: i32) -> (i32, i32) {
    %c0_i32 = arith.constant 0 : i32
    %c0_i32_0 = arith.constant 0 : i32
    %c0_i32_1 = arith.constant 0 : i32
    return %c0_i32, %c0_i32_0 : i32, i32
  }
}

</mosaic_0001>

<bundles_post_ra>
// kernel: tpu_custom_call.1
= control target key start
LH: loop header
LB: loop body
LE: loop exit
PB: predicated region body
PF: predicated region fallthrough
CT: control target
= control target key end

     0   :  { %s1645_s0 = inlined_call_operand.vmem [shape: f32[16,8], index: 0, kind: input, shape index: {}]   ;;  %s1646_s1 = inlined_call_operand.vmem [shape: f32[8,16], index: 1, kind: input, shape index: {}]   ;;  %s1647_s2 = inlined_call_operand.hbm [shape: f32[4,8,16], index: 2, kind: input, shape index: {}]   ;;  %s1648_s3 = inlined_call_operand.vmem [shape: f32[4,1,8], index: 3, kind: input, shape index: {}]   ;;  %s1649_s4 = inlined_call_operand.vmem [shape: f32[4,8,1], index: 4, kind: input, shape index: {}]   ;;  %s1650_s5 = inlined_call_operand.vmem [shape: f32[4,16,16], index: 5, kind: input, shape index: {}]   ;;  %s1651_s6 = inlined_call_operand.vmem [shape: f32[4,1,16], index: 6, kind: input, shape index: {}]   ;;  %s1652_s7 = inlined_call_operand.vmem [shape: f32[2,16], index: 7, kind: input, shape index: {}]   ;;  %s1653_s8 = inlined_call_operand.hbm [shape: f32[4,16,32], index: 8, kind: input, shape index: {}]   ;;  %s1654_s9 = inlined_call_operand.vmem [shape: f32[1,32], index: 9, kind: input, shape index: {}]   ;;  %s1655_s10 = inlined_call_operand.vmem [shape: f32[32,6], index: 10, kind: input, shape index: {}]   ;;  %s1656_s11 = inlined_call_operand.vmem [shape: f32[1,6], index: 11, kind: input, shape index: {}]   ;;  %s1657_s12 = inlined_call_operand.hbm [shape: f32[2,6], index: 12, kind: output, shape index: {0}]   ;;  %s1658_s13 = inlined_call_operand.hbm [shape: f32[2,6], index: 13, kind: output, shape index: {1}]   ;;  %s1659_s14 = inlined_call_operand.hbm [shape: f32[2,32], index: 14, kind: output, shape index: {2}]  }
   0x1   :  { %1663 = sst [smem:[#allocation19_spill]] %s1647_s2 }
   0x2   :  { %1664 = sst [smem:[#allocation20_spill]] %s1657_s12 }
   0x3   :  { %1665 = sst [smem:[#allocation21_spill]] %s1658_s13 }
   0x4   :  { %1666 = sst [smem:[#allocation22_spill]] %s1659_s14 }
   0x5   :  { %20 = vsyncpa [#allocation4], 0 }
   0x6   :  { %22 = vsyncpa [#allocation4 + $0x1], 0 }
   0x7   :  { %23 = vsyncpa [#allocation7], 0 }
   0x8   :  { %25 = vsyncpa [#allocation7 + $0x1], 0 }
   0x9   :  { %26 = vsyncpa [#allocation5], 0 }
   0xa   :  { %27 = vsyncpa [#allocation10], 0  ;;  %s1412_s29 = smov 0   ;;  %s1414_s30 = smov 0  }
   0xb   :  { %s1416_s15 = smov 0   ;;  %s1418_s16 = smov 0  }
   0xc LB: > { %1667 = sst [smem:[#allocation16_spill]] %s1324_s15  ;;  %s1431_s17 = sadd.s32 4294967295, %s1328_s16   ;;  %s1328_s16 = sphi %s1418_s16, %s1678_s16   ;;  %s1324_s15 = sphi %s1416_s15, %s1680_s15   ;;  %s1320_s30 = sphi %s1414_s30, %s1682_s30   ;;  %s1316_s29 = sphi %s1412_s29, %s1681_s29  }
   0xd   : > { %s1434_s18 = sadd.s32 1, %s1328_s16   ;;  %s82_s20 = sadd.s32 1, %s1324_s15 }
   0xe   : > { %1668 = sst [smem:[#allocation17_spill]] %s1434_s18  ;;  %s79_s19 = ssub.s32 %s1328_s16, %s1434_s18 }
   0xf   : > { %p80_p0 = scmp.eq.s32.totalorder %s79_s19, 0  ;;  %p89_p1 = scmp.ne.s32.totalorder %s1324_s15, %s1320_s30 }
  0x10   : > { %p90_p2 = scmp.eq.s32.totalorder %s1328_s16, 0  ;;  %p95_p3 = scmp.ne.s32.totalorder %s1320_s30, %s1316_s29 }
  0x11   : > { %s1444_s21 = scalar_select %p80_p0, %s1324_s15, %s82_s20  }
  0x12   : > { %p1446_p4 = por %p90_p2, %p89_p1  ;;  %p96_p5 = scmp.eq.s32.totalorder %s1431_s17, 0 }
  0x13   : > { %1669 = sst [smem:[#allocation18_spill]] %s1444_s21  ;;  %p1076_p6 = scmp.lt.s32.totalorder %s1328_s16, 4 }
  0x14   : > { %p1452_p7 = por %p96_p5, %p95_p3  ;;  %s1457_s24 = sand.u32 1, %s1324_s15  }
  0x15   : > { %s1021_s25 = sshll.u32 %s1457_s24, 3  ;;  %s1022_s26 = sshll.u32 %s1328_s16, 3 }
  0x16   : > { %s1672_s2 = sld [smem:[#allocation19_spill]]  ;;  %s418_s19 = scalar_lea.vmem [#allocation3], %s1021_s25 }
  0x17   : > { %s426_s20 = sshll.u32 %s418_s19, 4  ;;  %p1466_p8 = pnand %p1076_p6, %p1446_p4  ;;  %s427_s20 = int_to_ptr.vmem [resolvable:$true] %s426_s20 }
  0x18   : > { %p1026_p9 = scmp.ge.s32.totalorder %s1328_s16, 1  ;;  %p480_p10 = scmp.lt.s32.totalorder %s1328_s16, 5 }
  0x19   : > { %s415_s15 = scalar_lea.sflag [#allocation4], %s1457_s24  ;;  %p1142_p12 = pneg %p1466_p8 }
  0x1c   : > { %s422_s29 = scalar_lea.hbm %s1672_s2, %s1022_s26  ;;  %s1145_s26 = scalar_lea.hbm %s1672_s2, 32 }
  0x1d   : > { %s424_s21 = sshll.u32 %s422_s29, 4  ;;  %s425_s21 = int_to_ptr.hbm [resolvable:$true] %s424_s21 }
  0x1e   : > { %s1138_s14 = sshra.s32 %s425_s21, 4  ;;  %s1139_s14 = int_to_ptr.hbm [resolvable:$true] %s1138_s14 }
  0x1f   : > { %s1140_s12 = scalar_lea.hbm %s1139_s14, 8  ;;  %p1146_p1 = scmp.lt.s32.totalorder %s1139_s14, %s1672_s2 }
  0x20   : > { %p1141_p11 = scmp.ne.s32.totalorder %s1139_s14, %s1140_s12  ;;  %p1147_p2 = scmp.lt.s32.totalorder %s1145_s26, %s1140_s12 }
  0x22   : > { %p1143_p13 = pnand %p1142_p12, %p1141_p11  ;;  %p1148_p3 = por %p1147_p2, %p1146_p1 }
  0x24   : > { %p1144_p0 = pneg %p1143_p13 }
  0x26   : > { %p1149_p4 = pnand %p1148_p3, %p1144_p0 }
  0x28   : > { %1152 = shalt.err (!%p1149_p4)
}
  0x29   : > { %1072 = dma.hbm_to_vmem [thread:$0]  (!%p1466_p8), %s425_s21, 128, %s427_s20, %s415_s15  }
  0x2a   : > { %p1490_p5 = pnand %p1026_p9, %p480_p10  ;;  %s1023_s14 = sshll.u32 %s1457_s24, 4 }
  0x2b   : > { %s1051_s12 = sshll.u32 %s1328_s16, 4  ;;  %s464_s26 = scalar_lea.vmem [#allocation6], %s1023_s14 }
  0x2c   : > { %s469_s25 = scalar_lea.hbm %s1653_s8, %s1051_s12  ;;  %s472_s27 = sshll.u32 %s464_s26, 4  ;;  %s473_s27 = int_to_ptr.vmem [resolvable:$true] %s472_s27 }
  0x2d   : > { %s470_s28 = sshll.u32 %s469_s25, 4  ;;  %s461_s2 = scalar_lea.sflag [#allocation7], %s1457_s24  ;;  %s471_s28 = int_to_ptr.hbm [resolvable:$true] %s470_s28 }
  0x2e   : > { %s1168_s13 = sshra.s32 %s471_s28, 4  ;;  %s1175_s20 = scalar_lea.hbm %s1653_s8, 64  ;;  %s1169_s13 = int_to_ptr.hbm [resolvable:$true] %s1168_s13 }
  0x2f   : > { %s1170_s15 = scalar_lea.hbm %s1169_s13, 16  ;;  %p1176_p11 = scmp.lt.s32.totalorder %s1169_s13, %s1653_s8 }
  0x30   : > { %p1171_p6 = scmp.ne.s32.totalorder %s1169_s13, %s1170_s15  ;;  %p1177_p13 = scmp.lt.s32.totalorder %s1175_s20, %s1170_s15 }
  0x32   : > { %p1173_p9 = pnand %p1171_p6, %p1142_p12  ;;  %p1178_p0 = por %p1177_p13, %p1176_p11 }
  0x34   : > { %p1174_p10 = pneg %p1173_p9 }
  0x36   : > { %p1179_p1 = pnand %p1178_p0, %p1174_p10 }
  0x38   : > { %1182 = shalt.err (!%p1179_p1)
}
  0x39   : > { %s1330_s24 = smov 128   ;;  %s1331_s14 = smov 8  }
  0x3a   : > { %1075 = dma.hbm_to_vmem [thread:$0]  (!%p1466_p8), %s471_s28, 256, %s473_s27, %s461_s2, %s1330_s24, %s1330_s24, %s1331_s14  }
  0x3b   : > { %484 = sbr.rel (%p1490_p5) target bundleno = 1413 (0x585), region = 68  ;;  %s486_s22 = sand.u32 (!%p1490_p5), 1, %s1320_s30  }
  0x3c   : > { %s1027_s25 = sshll.u32 (!%p1490_p5), %s486_s22, 3  ;;  %s487_s26 = scalar_lea.sflag (!%p1490_p5), [#allocation4], %s486_s22 }
  0x3d   : > { %s1514_s21 = scalar_lea.vmem (!%p1490_p5), [#allocation3], %s1027_s25 }
  0x40   : > { %1299 = dma.done.wait (%p1452_p7), %s487_s26, 128  }
  0x41   : > { %1301 = vsyncadd (%p1452_p7), %s487_s26, 4294967168  ;;  %s1028_s13 = sshll.u32 %s486_s22, 4  ;;  %s497_s15 = scalar_lea.sflag [#allocation7], %s486_s22 }
  0x42   : > { %s1520_s18 = scalar_lea.vmem [#allocation6], %s1028_s13 }
  0x43   : > { %1303 = dma.done.wait (%p1452_p7), %s497_s15, 256  }
  0x44   : > { %1305 = vsyncadd (%p1452_p7), %s497_s15, 4294967040  ;;  %p561_p8 = scmp.lt.s32.totalorder %s1431_s17, 3  ;;  %p1032_p7 = scmp.ne.s32.totalorder %s1431_s17, 0 }
  0x46   : > { %s1528_s2 = scalar_select %p561_p8, %s1431_s17, 3 }
  0x47   : > { %580 = sbr.rel (%p1032_p7) target bundleno = 78 (0x4e), region = 80 }
  0x48   : > { %s563_s28 = scalar_lea.vmem %s1648_s3, %s1528_s2  ;;  %s1029_s16 = sshll.u32 %s1528_s2, 3 }
  0x49   : > { %s567_s12 = scalar_lea.vmem %s1649_s4, %s1029_s16  ;;  %s1052_s23 = sshll.u32 %s1528_s2, 4 }
  0x4a   : > { %s1542_s22 = scalar_lea.vmem %s1650_s5, %s1052_s23  ;;  %s575_s13 = scalar_lea.vmem %s1651_s6, %s1528_s2 }
  0x4c   : > { %vm581_vm0 = vcmask 254976   ;;  %v1332_v0 = vmov 0.0  }
  0x4d   : > { %582 = vst.msk [vmem:[#allocation2] sm:$0x3] %vm581_vm0, %v1332_v0 }
  0x4e PF: > { %v616_v1 = vld [vmem:[%s567_s12] sm:$0xff]  ;;  %vm586_vm1 = vcmask 64512   ;;  %v1333_v5 = vmov 0   ;;  %v584_v6 = vld [vmem:[%s1645_s0 + $0x8] sm:$0xff]  ;;  %vm688_vm3 = vcmask 130048   ;;  %vm785_vm5 = vcmask 254976  }
  0x4f   : > { %v583_v2 = vld [vmem:[%s1645_s0] sm:$0xff]  ;;  %632 = vmatpush.msra.mxu1 %v616_v1  ;;  %1122 = vset.pattern.permute.xlu0 %v1333_v5  ;;  %v679_v18 = vld [vmem:[%s1542_s22 + $0x8] sm:$0xff]  ;;  %p1041_p12 = scmp.ne.s32.totalorder %s1431_s17, 3 }
  0x50   : > { %v641_v3 = vld [vmem:[%s1646_s1] sm:$0xff]  ;;  %1035 = vmatmul.msk.f32.vlgmr.msra.gmra.mxu1 %vm586_vm1, %v583_v2 }
  0x51   : > { %v640_v4 = vld [vmem:[%s563_s28] sm:$0x1]  ;;  %660 = vmatpush.msra.mxu2 %v641_v3  ;;  %v585_v9 = vld [vmem:[%s1514_s21] sm:$0xff]  ;;  %v759_v47 = vld [vmem:[%s1520_s18] sm:$0xff] }
  0x52   : > { %1037 = vmatmul.msk.f32.vlgmr.msra.gmra.mxu2 %vm586_vm1, %v640_v4  ;;  %608 = vmatpush.msra.mxu0 %v585_v9  ;;  %v678_v12 = vld [vmem:[%s1542_s22] sm:$0xff] }
  0x53   : > { %1033 = vmatmul.msk.f32.vlgmr.msra.gmra.mxu0 %vm586_vm1, %v583_v2  ;;  %v760_v46 = vld [vmem:[%s1520_s18 + $0x8] sm:$0xff] }
  0x54   : > { %778 = vmatpush.msrb.mxu0 %v760_v46  ;;  %v1123_v49 = vld [vmem:[%s575_s13] ss:$0 sm:$0xff] }
  0x55   : > { %v734_v53 = vld [vmem:[%s1652_s7] sm:$0x3] }
  0x56   : > { %779 = vmatpush.msrb.mxu0 %v759_v47  ;;  %v758_v55 = vld [vmem:[#allocation2] sm:$0x3] }
  0x58   : > { %1036 = vmatmul.msk.f32.gmra.mxu1 %vm586_vm1, %v584_v6 }
  0x5b   : > { %1034 = vmatmul.msk.f32.gmra.mxu0 %vm586_vm1, %v584_v6 }
  0xcd   : > { %v634_v7 = vpop.f32.mrf.mxu1 }
  0xce   : > { %667 = vperm.xlu0 %1122, %v634_v7  }
  0xd0   : > { %v610_v36 = vpop.f32.mrf.mxu0 }
  0xd5   : > { %v637_v8 = vpop.f32.mrf.mxu1  ;;  %v662_v10 = vpop.f32.mrf.mxu2 }
  0xd6   : > { %672 = vperm.xlu0 %1122, %v637_v8   ;;  %v675_v11 = vperm.slane %v662_v10, 0 }
  0xd8   : > { %v613_v37 = vpop.f32.mrf.mxu0 }
  0xd9   : > { %v712_v38 = vpack.c.bf16 %v613_v37, %v610_v36 }
  0xdb   : > { %727 = vmatpush.bf16.msra.mxu3 %v712_v38 }
 0x140   : > { %v668_v13 = vpop.permute.xlu0 %667 }
 0x141   : > { %v676_v14 = vadd.f32 %v675_v11, %v668_v13 }
 0x143   : > { %v680_v15 = vadd.f32 %v678_v12, %v676_v14 }
 0x145   : > { %vm682_vm2 = vcmp.ge.f32.partialorder %v680_v15, 0.0  ;;  %v684_v16 = vmul.f32 0.2, %v680_v15 }
 0x147   : > { %v686_v17 = vsel %vm682_vm2, %v680_v15, %v684_v16 }
 0x148   : > { %v673_v19 = vpop.permute.xlu0 %672  ;;  %v689_v20 = vsel %vm688_vm3, %v686_v17, -inf }
 0x149   : > { %v677_v21 = vadd.f32 %v675_v11, %v673_v19  ;;  %690 = vmax.xlane.f32.xlu1 %v689_v20 }
 0x14b   : > { %v681_v22 = vadd.f32 %v679_v18, %v677_v21 }
 0x14d   : > { %vm683_vm4 = vcmp.ge.f32.partialorder %v681_v22, 0.0  ;;  %v685_v23 = vmul.f32 0.2, %v681_v22 }
 0x14f   : > { %v687_v24 = vsel %vm683_vm4, %v681_v22, %v685_v23 }
 0x150   : > { %v692_v25 = vsel %vm688_vm3, %v687_v24, -inf }
 0x151   : > { %693 = vmax.xlane.f32.xlu1 %v692_v25 }
 0x1bc   : > { %v691_v26 = vpop.xlane.xlu1 %690 }
 0x1bd   : > { %v695_v27 = vsub.f32 %v686_v17, %v691_v26 }
 0x1bf   : > { %v697_v28 = vmul.f32 1.442695, %v695_v27 }
 0x1c1   : > { %1124 = vpow2.f32 %v697_v28 }
 0x1c4   : > { %v694_v29 = vpop.xlane.xlu1 %693 }
 0x1c5   : > { %v696_v30 = vsub.f32 %v687_v24, %v694_v29 }
 0x1c7   : > { %v1125_v31 = vpop.eup %1124  ;;  %v699_v32 = vmul.f32 1.442695, %v696_v30 }
 0x1c8   : > { %v701_v33 = vsel %vm688_vm3, %v1125_v31, 0.0 }
 0x1c9   : > { %1126 = vpow2.f32 %v699_v32  ;;  %702 = vadd.xlane.f32.xlu2 %v701_v33 }
 0x1cf   : > { %v1127_v34 = vpop.eup %1126 }
 0x1d0   : > { %v704_v35 = vsel %vm688_vm3, %v1127_v34, 0.0 }
 0x1d1   : > { %705 = vadd.xlane.f32.xlu2 %v704_v35 }
 0x23c   : > { %v703_v39 = vpop.xlane.xlu2 %702 }
 0x23d   : > { %1128 = vrcp.f32 %v703_v39 }
 0x243   : > { %v1129_v41 = vpop.eup %1128 }
 0x244   : > { %v706_v40 = vpop.xlane.xlu2 %705  ;;  %v709_v43 = vmul.f32 %v1129_v41, %v1125_v31 }
 0x245   : > { %1130 = vrcp.f32 %v706_v40 }
 0x24b   : > { %v1131_v42 = vpop.eup %1130 }
 0x24c   : > { %v710_v44 = vmul.f32 %v1131_v42, %v1127_v34 }
 0x24e   : > { %v711_v45 = vpack.c.bf16 %v710_v44, %v709_v43 }
 0x250   : > { %1038 = vmatmul.msk.bf16.vlgmr.msra.gmra.mxu3 %vm688_vm3, %v711_v45 }
 0x2d3   : > { %v729_v48 = vpop.f32.mrf.mxu3 }
 0x2d4   : > { %v730_v52 = vadd.f32 %v1123_v49, %v729_v48 }
 0x2db   : > { %v731_v50 = vpop.f32.mrf.mxu3 }
 0x2dc   : > { %v732_v51 = vadd.f32 %v1123_v49, %v731_v50 }
 0x2de   : > { %752 = vmatpush.msrb.mxu2 %v732_v51 }
 0x2e0   : > { %753 = vmatpush.msrb.mxu2 %v730_v52 }
 0x2e1   : > { %1039 = vmatmul.msk.f32.vlgmr.msrb.gmra.mxu2 %vm688_vm3, %v734_v53 }
 0x364   : > { %v755_v54 = vpop.f32.mrf.mxu2 }
 0x365   : > { %1040 = vmatmul.msk.f32.vlgmr.msrb.gmra.mxu0 %vm688_vm3, %v755_v54 }
 0x3e1   : > { %790 = sbr.rel (%p1041_p12) target bundleno = 1396 (0x574), region = 84 }
 0x3e2   : > { %v781_v56 = vpop.f32.mrf.mxu0 }
 0x3e3   : > { %v784_v57 = vadd.f32 %v781_v56, %v758_v55 }
 0x3e5   : > { %786 = vst.msk [vmem:[#allocation2] sm:$0x3] %vm785_vm5, %v784_v57 }
 0x3e6   : > { %v801_v58 = vld [vmem:[%s1655_s10 + $0x18] sm:$0xff]  ;;  %v800_v59 = vld [vmem:[%s1655_s10 + $0x10] sm:$0xff]  ;;  %v799_v61 = vld [vmem:[%s1655_s10 + $0x8] sm:$0xff]  ;;  %vm806_vm6 = vcmask 261120   ;;  %vm830_vm7 = vcmask 41984  }
 0x3e7   : > { %822 = vmatpush.msra.mxu0 %v801_v58  ;;  %v1132_v62 = vld [vmem:[%s1654_s9] ss:$0 sm:$0xff] }
 0x3e8   : > { %v798_v63 = vld [vmem:[%s1655_s10] sm:$0xff] }
 0x3e9   : > { %823 = vmatpush.msra.mxu0 %v800_v59  ;;  %v1133_v2 = vld [vmem:[%s1656_s11] ss:$0 sm:$0xff] }
 0x3eb   : > { %824 = vmatpush.msra.mxu0 %v799_v61 }
 0x3ec   : > { %v791_v60 = vld [vmem:[#allocation2] sm:$0x3] }
 0x3ed   : > { %v796_v0 = vadd.f32 %v1132_v62, %v791_v60  ;;  %825 = vmatpush.msra.mxu0 %v798_v63 }
 0x3ef   : > { %v797_v1 = vmax.f32 %v796_v0, 0.0 }
 0x3f1   : > { %1042 = vmatmul.msk.f32.vlgmr.msra.gmra.mxu0 %vm806_vm6, %v797_v1  ;;  %846 = vst.msk [vmem:[#allocation11] sm:$0x3] %vm785_vm5, %v797_v1 }
 0x46e   : > { %v827_v3 = vpop.f32.mrf.mxu0 }
 0x46f   : > { %v828_v4 = vadd.f32 %v1133_v2, %v827_v3 }
 0x471   : > { %v831_v5 = vsel %vm830_vm7, %v828_v4, -inf  ;;  %845 = vst.msk [vmem:[#allocation9] sm:$0x3] %vm830_vm7, %v828_v4 }
 0x472   : > { %832 = vmax.xlane.f32.xlu0 %v831_v5 }
 0x4e5   : > { %v833_v6 = vpop.xlane.xlu0 %832 }
 0x4e6   : > { %v834_v7 = vsub.f32 %v828_v4, %v833_v6 }
 0x4e8   : > { %v835_v8 = vmul.f32 1.442695, %v834_v7 }
 0x4ea   : > { %1134 = vpow2.f32 %v835_v8 }
 0x4f0   : > { %v1135_v9 = vpop.eup %1134 }
 0x4f1   : > { %v837_v10 = vsel %vm830_vm7, %v1135_v9, 0.0 }
 0x4f2   : > { %838 = vadd.xlane.f32.xlu0 %v837_v10 }
 0x565   : > { %v839_v11 = vpop.xlane.xlu0 %838 }
 0x566   : > { %1136 = vlog2.f32 %v839_v11 }
 0x56c   : > { %v1137_v12 = vpop.eup %1136 }
 0x56d   : > { %v841_v13 = vmul.f32 0.6931472, %v1137_v12 }
 0x56f   : > { %v842_v14 = vadd.f32 %v841_v13, %v833_v6 }
 0x571   : > { %v843_v15 = vsub.f32 %v828_v4, %v842_v14 }
 0x573   : > { %844 = vst.msk [vmem:[#allocation8] sm:$0x3] %vm830_vm7, %v843_v15 }
 0x574 PF: > { %p1077_p2 = scmp.eq.s32.totalorder %s1431_s17, 3  ;;  %s1334_s20 = smov [#allocation9]  }
 0x575   : > { %s865_s19 = sshll.u32 %s1334_s20, 4  ;;  %s1675_s12 = sld [smem:[#allocation21_spill]]  ;;  %s866_s19 = int_to_ptr.vmem [resolvable:$true] %s865_s19 }
 0x576   : > { %s1676_s24 = sld [smem:[#allocation20_spill]]  ;;  %s1335_s22 = smov [#allocation8]  }
 0x577   : > { %s853_s25 = sshll.u32 %s1335_s22, 4  ;;  %s1336_s26 = smov [#allocation11]   ;;  %s854_s25 = int_to_ptr.vmem [resolvable:$true] %s853_s25 }
 0x578   : > { %s877_s13 = sshll.u32 %s1336_s26, 4  ;;  %s1677_s27 = sld [smem:[#allocation22_spill]]  ;;  %s878_s13 = int_to_ptr.vmem [resolvable:$true] %s877_s13 }
 0x57b   : > { %s867_s23 = sshll.u32 %s1675_s12, 4  ;;  %s868_s23 = int_to_ptr.hbm [resolvable:$true] %s867_s23 }
 0x57c   : > { %1060 = dma.vmem_to_hbm [thread:$0]  (%p1077_p2), %s866_s19, 32, %s868_s23, [#allocation10]  }
 0x57d   : > { %s855_s14 = sshll.u32 %s1676_s24, 4  ;;  %s856_s14 = int_to_ptr.hbm [resolvable:$true] %s855_s14 }
 0x57e   : > { %1058 = dma.vmem_to_hbm [thread:$0]  (%p1077_p2), %s854_s25, 32, %s856_s14, [#allocation5]  }
 0x57f   : > { %s879_s16 = sshll.u32 %s1677_s27, 4  ;;  %s880_s16 = int_to_ptr.hbm [resolvable:$true] %s879_s16 }
 0x580   : > { %1062 = dma.vmem_to_hbm [thread:$0]  (%p1077_p2), %s878_s13, 32, %s880_s16, [#allocation10]  }
 0x581   : > { %1307 = dma.done.wait (%p1077_p2), [#allocation5], 32  }
 0x582   : > { %1309 = vsyncadd (%p1077_p2), [#allocation5], 4294967264 }
 0x583   : > { %1311 = dma.done.wait (%p1077_p2), [#allocation10], 64  }
 0x584   : > { %1313 = vsyncadd (%p1077_p2), [#allocation10], 4294967232 }
 0x585 PF: > { %s1678_s16 = sld [smem:[#allocation17_spill]]  ;;  %s1681_s29 = smov %s1320_s30 }
 0x586   : > { %s1679_s20 = sld [smem:[#allocation16_spill]] }
 0x587   : > { %s1680_s15 = sld [smem:[#allocation18_spill]] }
 0x58b   : > { %p30_p3 = scmp.ge.s32.totalorder %s1678_s16, 6  }
 0x58c   : > { %s1682_s30 = smov %s1679_s20 }
 0x58d   :  { %32 = sbr.rel (!%p30_p3) target bundleno = 12 (0xc), region = 154 }
 0x592   :  { %903 = vsyncpa [#allocation4], 1 }
 0x593   :  { %905 = vsyncpa [#allocation4 + $0x1], 1 }
 0x594   :  { %906 = vsyncpa [#allocation7], 1 }
 0x595   :  { %908 = vsyncpa [#allocation7 + $0x1], 1 }
 0x596   :  { %909 = vsyncpa [#allocation5], 1 }
 0x597   :  { %911 = vsyncpa [#allocation5 + $0x1], 1 }
 0x598   :  { %912 = vsyncpa [#allocation10], 1 }

</bundles_post_ra>
